<compile_context>
chip_gen: v7x
topology: tpu7x:2x2x1
jax: 0.10.0
libtpu: 0.0.40
codegen_flags: <defaults>
</compile_context>

<pallas_src>
import functools
import math

import jax
import jax.numpy as jnp
from jax.experimental import pallas as pl
from jax.experimental.pallas import tpu as pltpu


def _round_up(x, m):
    return ((x + m - 1) // m) * m


def _attention_kernel(x_ref, wf_ref, bf_ref, agg_ref, wts_ref, *, bb, t, score_col):
    # Block shapes:
    #   x_ref   : (R, D)        R = bb*T rows (bb whole batch elements)
    #   wf_ref  : (D, Dp)       fused [value | score | pad] weights (resident)
    #   bf_ref  : (1, Dp)       fused bias
    #   agg_ref : (1, bb, Da)   lane-dense aggregation slab (Da = D or Dp)
    #   wts_ref : (1, 1, R)     lane-dense weights slab
    d_agg = agg_ref.shape[-1]

    # Single fused MXU pass: value columns + one score column.
    y = jnp.dot(x_ref[...], wf_ref[...],
                preferred_element_type=jnp.float32) + bf_ref[...]        # (R, Dp)

    scores = y[:, score_col:score_col + 1]                               # (R, 1), aligned
    # logistic(s, c=1, a=20, b=e) = 1 / (1 + 20 * exp(-s))   (exp -> EUP slot)
    weights = 1.0 / (1.0 + 20.0 * jnp.exp(-scores))                      # (R, 1)

    # Per-batch weighted sum over time: VPU multiply + sublane reduce,
    # restricted to the lane groups that actually feed the output.
    yv = y[:, :d_agg]                                                    # (R, Da)
    agg_ref[0] = jnp.sum(yv.reshape(bb, t, d_agg) * weights.reshape(bb, t, 1),
                         axis=1)                                         # (bb, Da)

    wts_ref[0] = weights.T                                               # (1, R)


def simple_attention_pallas(embeds, wk, bk, wv, bv, query, *,
                            target_block_bytes=2 << 20):
    """embeds: (B, T, D); wk/wv: (D, D) torch layout (out, in); bk/bv/query: (D,)."""
    B, T, D = embeds.shape
    f32 = jnp.float32
    x = embeds.astype(f32)
    wk = wk.astype(f32)
    wv = wv.astype(f32)
    bk = bk.astype(f32)
    bv = bv.astype(f32)
    query = query.astype(f32)

    # --- weight prep (in production: pre-fuse once outside the hot path) -----
    # scores = (x @ Wk.T + bk) . q  ==  x @ (Wk.T @ q) + (bk . q)
    wq = wk.T @ query                        # (D,)
    bkq = jnp.dot(bk, query)                 # scalar

    if D % 128 == 0:
        # Score column gets its own trailing lane group; epilogue drops it.
        dp = D + 128
        score_col = D
        d_agg = D
        agg_lo = 0
        w_fused = jnp.concatenate(
            [wv.T, wq[:, None], jnp.zeros((D, 127), f32)], axis=1)       # (D, Dp)
        b_fused = jnp.concatenate(
            [bv, bkq[None], jnp.zeros((127,), f32)])[None, :]            # (1, Dp)
    else:
        # Score column at lane 0 (aligned slice); value columns follow.
        dp = _round_up(D + 1, 128)
        score_col = 0
        d_agg = dp
        agg_lo = 1
        w_fused = jnp.concatenate(
            [wq[:, None], wv.T, jnp.zeros((D, dp - D - 1), f32)], axis=1)
        b_fused = jnp.concatenate(
            [bkq[None], bv, jnp.zeros((dp - D - 1,), f32)])[None, :]

    # --- row tiling -----------------------------------------------------------
    # bb*T must be a multiple of 8 (sublane rule on the (R, D) input block),
    # so bb is chosen in granules of `step`. Tile sized from a byte budget.
    step = 8 // math.gcd(T, 8)
    rows_target = max(8, target_block_bytes // (4 * D))        # ~2 MiB input block
    bb_cap = max(step, (rows_target // max(T, 1)) // step * step)

    g = pl.cdiv(B, bb_cap)
    if B >= 2:
        g = max(g, 2)                    # >= 2 parallel steps keeps both v7x TCs busy
    g = min(g, pl.cdiv(B, step))         # never more steps than batch granules
    bb = _round_up(pl.cdiv(B, g), step)  # balanced tile, minimal batch padding
    g = pl.cdiv(B, bb)
    b_pad = g * bb
    r = bb * T

    x2d = x.reshape(B * T, D)            # 2-D layout: flatten is free, no sublane pad
    if b_pad != B:                       # pad only whole batch elements (sliced off later)
        x2d = jnp.pad(x2d, ((0, (b_pad - B) * T), (0, 0)))

    # --- explicit VMEM budget -------------------------------------------------
    # double-buffered input block + fused-matmul result + resident fused weights
    # (2 bufs) + double-buffered output slabs, plus headroom. v5e's default
    # scoped limit (~16 MiB) is the binding one; cap at 64 MiB for v7x.
    est_bytes = 4 * (2 * r * D + 2 * r * dp + 2 * (D * dp + dp)
                     + 2 * (bb * d_agg + r))
    vmem_limit = int(min(max(est_bytes + (8 << 20), 32 << 20), 64 << 20))

    kernel = functools.partial(_attention_kernel, bb=bb, t=T, score_col=score_col)

    agg3, wts3 = pl.pallas_call(
        kernel,
        out_shape=(
            jax.ShapeDtypeStruct((g, bb, d_agg), f32),    # aggregation slab
            jax.ShapeDtypeStruct((g, 1, r), f32),         # weights slab
        ),
        grid_spec=pltpu.PrefetchScalarGridSpec(
            num_scalar_prefetch=0,
            grid=(g,),
            in_specs=[
                pl.BlockSpec((r, D), lambda i: (i, 0)),       # embeds row tile
                pl.BlockSpec((D, dp), lambda i: (0, 0)),      # fused weights (resident)
                pl.BlockSpec((1, dp), lambda i: (0, 0)),      # fused bias (resident)
            ],
            out_specs=[
                pl.BlockSpec((1, bb, d_agg), lambda i: (i, 0, 0)),
                pl.BlockSpec((1, 1, r), lambda i: (i, 0, 0)),
            ],
        ),
        compiler_params=pltpu.CompilerParams(
            dimension_semantics=("parallel",),
            vmem_limit_bytes=vmem_limit),
    )(x2d, w_fused, b_fused)

    agg = agg3.reshape(b_pad, d_agg)[:B, agg_lo:agg_lo + D]
    wts = wts3.reshape(b_pad, T)[:B]
    return agg, wts


def _reference(embeds, wk, bk, wv, bv, query):
    value = jnp.einsum('btj,kj->btk', embeds, wv) + bv
    keys = jnp.einsum('btj,kj->btk', embeds, wk) + bk
    scores = jnp.einsum('btj,j->bt', keys, query)
    weights = 1.0 / (1.0 + 20.0 * jnp.exp(-scores))
    aggr = jnp.einsum('btj,bt->bj', value, weights)
    return aggr, weights


if __name__ == "__main__":
    B, T, D = 2, 8, 32   # small shapes; module default input_dim=100 scaled down

    key = jax.random.PRNGKey(0)
    k_x, k_wk, k_bk, k_wv, k_bv, k_q = jax.random.split(key, 6)

    embeds = jax.random.normal(k_x, (B, T, D), dtype=jnp.float32)

    # torch.nn.Linear layout: weight (out, in), bias (out,); query ~ normal.
    bound = 1.0 / jnp.sqrt(D)
    wk = jax.random.uniform(k_wk, (D, D), jnp.float32, -bound, bound)
    bk = jax.random.uniform(k_bk, (D,), jnp.float32, -bound, bound)
    wv = jax.random.uniform(k_wv, (D, D), jnp.float32, -bound, bound)
    bv = jax.random.uniform(k_bv, (D,), jnp.float32, -bound, bound)
    query = jax.random.normal(k_q, (D,), dtype=jnp.float32)

    agg, wts = simple_attention_pallas(embeds, wk, bk, wv, bv, query)
    jax.block_until_ready((agg, wts))

    agg_ref, wts_ref = _reference(embeds, wk, bk, wv, bv, query)
    assert jnp.allclose(agg, agg_ref, atol=1e-4, rtol=1e-4), "aggregations mismatch"
    assert jnp.allclose(wts, wts_ref, atol=1e-4, rtol=1e-4), "weights mismatch"

    print("KERNEL_OK")
</pallas_src>

<mosaic_0001>
module attributes {stable_mosaic.version = 11 : i64} {
  func.func @_attention_kernel(%arg0: i32, %arg1: memref<8x32xf32, #tpu.memory_space<vmem>>, %arg2: memref<32x128xf32, #tpu.memory_space<vmem>>, %arg3: memref<1x128xf32, #tpu.memory_space<vmem>>, %arg4: memref<1x1x128xf32, #tpu.memory_space<vmem>>, %arg5: memref<1x1x8xf32, #tpu.memory_space<vmem>>) attributes {dimension_semantics = [#tpu.dimension_semantics<parallel>], iteration_bounds = array<i64: 2>, scalar_prefetch = 0 : i64, scratch_operands = 0 : i64, tpu.core_type = #tpu.core_type<tc>, window_params = [{transform_indices = @transform_0, window_bounds = array<i64: 8, 32>}, {pipeline_mode = #tpu.pipeline_mode<synchronous>, transform_indices = @transform_1, window_bounds = array<i64: 32, 128>}, {pipeline_mode = #tpu.pipeline_mode<synchronous>, transform_indices = @transform_2, window_bounds = array<i64: 1, 128>}, {transform_indices = @transform_3, window_bounds = array<i64: 1, 1, 128>}, {transform_indices = @transform_4, window_bounds = array<i64: 1, 1, 8>}]} {
    %c0 = arith.constant 0 : index
    %c0_0 = arith.constant 0 : index
    %0 = vector.load %arg1[%c0, %c0_0] : memref<8x32xf32, #tpu.memory_space<vmem>>, vector<8x32xf32>
    %c0_1 = arith.constant 0 : index
    %c0_2 = arith.constant 0 : index
    %1 = vector.load %arg2[%c0_1, %c0_2] : memref<32x128xf32, #tpu.memory_space<vmem>>, vector<32x128xf32>
    %cst = arith.constant dense<0.000000e+00> : vector<8x128xf32>
    %2 = tpu.matmul %0, %1, %cst {dimension_numbers = #tpu.dot_dimension_numbers<[1], [0], [0], [1], [0, 0, 1, 1], [], []>} : vector<8x32xf32>, vector<32x128xf32>, vector<8x128xf32> -> vector<8x128xf32>
    %c0_3 = arith.constant 0 : index
    %c0_4 = arith.constant 0 : index
    %3 = vector.load %arg3[%c0_3, %c0_4] : memref<1x128xf32, #tpu.memory_space<vmem>>, vector<1x128xf32>
    %4 = vector.broadcast %3 : vector<1x128xf32> to vector<8x128xf32>
    %5 = arith.addf %2, %4 : vector<8x128xf32>
    %6 = vector.extract_strided_slice %5 {offsets = [0, 0], sizes = [8, 1], strides = [1, 1]} : vector<8x128xf32> to vector<8x1xf32>
    %cst_5 = arith.constant 0.000000e+00 : f32
    %7 = vector.broadcast %cst_5 : f32 to vector<8x1xf32>
    %8 = arith.subf %7, %6 : vector<8x1xf32>
    %9 = math.exp %8 : vector<8x1xf32>
    %cst_6 = arith.constant 2.000000e+01 : f32
    %10 = vector.broadcast %cst_6 : f32 to vector<8x1xf32>
    %11 = arith.mulf %10, %9 : vector<8x1xf32>
    %cst_7 = arith.constant 1.000000e+00 : f32
    %12 = vector.broadcast %cst_7 : f32 to vector<8x1xf32>
    %13 = arith.addf %12, %11 : vector<8x1xf32>
    %cst_8 = arith.constant 1.000000e+00 : f32
    %14 = vector.broadcast %cst_8 : f32 to vector<8x1xf32>
    %15 = arith.divf %14, %13 : vector<8x1xf32>
    %16 = vector.shape_cast %5 : vector<8x128xf32> to vector<1x8x128xf32>
    %17 = vector.shape_cast %15 : vector<8x1xf32> to vector<1x8x1xf32>
    %18 = vector.broadcast %17 : vector<1x8x1xf32> to vector<1x8x128xf32>
    %19 = arith.mulf %16, %18 : vector<1x8x128xf32>
    %cst_9 = arith.constant dense<0.000000e+00> : vector<1x128xf32>
    %20 = vector.multi_reduction <add>, %19, %cst_9 [1] : vector<1x8x128xf32> to vector<1x128xf32>
    %c0_10 = arith.constant 0 : index
    %c0_11 = arith.constant 0 : index
    %c0_12 = arith.constant 0 : index
    %21 = vector.load %arg4[%c0_10, %c0_11, %c0_12] : memref<1x1x128xf32, #tpu.memory_space<vmem>>, vector<1x1x128xf32>
    %22 = vector.shape_cast %21 : vector<1x1x128xf32> to vector<1x128xf32>
    %23 = vector.shape_cast %20 : vector<1x128xf32> to vector<1x1x128xf32>
    tpu.vector_store %arg4[%c0_10, %c0_11, %c0_12], %23 {strides = array<i32>} : memref<1x1x128xf32, #tpu.memory_space<vmem>>, vector<1x1x128xf32>,
    %24 = tpu.transpose %15, [1, 0] : vector<8x1xf32> -> vector<1x8xf32>
    %c0_13 = arith.constant 0 : index
    %c0_14 = arith.constant 0 : index
    %c0_15 = arith.constant 0 : index
    %25 = vector.load %arg5[%c0_13, %c0_14, %c0_15] : memref<1x1x8xf32, #tpu.memory_space<vmem>>, vector<1x1x8xf32>
    %26 = vector.shape_cast %25 : vector<1x1x8xf32> to vector<1x8xf32>
    %27 = vector.shape_cast %24 : vector<1x8xf32> to vector<1x1x8xf32>
    tpu.vector_store %arg5[%c0_13, %c0_14, %c0_15], %27 {strides = array<i32>} : memref<1x1x8xf32, #tpu.memory_space<vmem>>, vector<1x1x8xf32>,
    return
  }
  func.func @transform_0(%arg0: i32) -> (i32, i32) {
    %c0_i32 = arith.constant 0 : i32
    %c0_i32_0 = arith.constant 0 : i32
    return %arg0, %c0_i32 : i32, i32
  }
  func.func @transform_1(%arg0: i32) -> (i32, i32) {
    %c0_i32 = arith.constant 0 : i32
    %c0_i32_0 = arith.constant 0 : i32
    %c0_i32_1 = arith.constant 0 : i32
    return %c0_i32, %c0_i32_0 : i32, i32
  }
  func.func @transform_2(%arg0: i32) -> (i32, i32) {
    %c0_i32 = arith.constant 0 : i32
    %c0_i32_0 = arith.constant 0 : i32
    %c0_i32_1 = arith.constant 0 : i32
    return %c0_i32, %c0_i32_0 : i32, i32
  }
  func.func @transform_3(%arg0: i32) -> (i32, i32, i32) {
    %c0_i32 = arith.constant 0 : i32
    %c0_i32_0 = arith.constant 0 : i32
    %c0_i32_1 = arith.constant 0 : i32
    return %arg0, %c0_i32, %c0_i32_0 : i32, i32, i32
  }
  func.func @transform_4(%arg0: i32) -> (i32, i32, i32) {
    %c0_i32 = arith.constant 0 : i32
    %c0_i32_0 = arith.constant 0 : i32
    %c0_i32_1 = arith.constant 0 : i32
    return %arg0, %c0_i32, %c0_i32_0 : i32, i32, i32
  }
}

</mosaic_0001>

<bundles_post_ra>
// kernel: tpu_custom_call.1
= control target key start
LH: loop header
LB: loop body
LE: loop exit
PB: predicated region body
PF: predicated region fallthrough
CT: control target
= control target key end

     0   :  { %10 = vsyncpa [#allocation3], 0  ;;  %s1052_s0 = inlined_call_operand.hbm [shape: f32[16,32], index: 0, kind: input, shape index: {}]   ;;  %s1053_s1 = inlined_call_operand.hbm [shape: f32[32,128], index: 1, kind: input, shape index: {}]   ;;  %s1054_s2 = inlined_call_operand.vmem [shape: f32[1,128], index: 2, kind: input, shape index: {}]   ;;  %s1055_s3 = inlined_call_operand.hbm [shape: f32[2,1,128], index: 3, kind: output, shape index: {0}]   ;;  %s1056_s4 = inlined_call_operand.hbm [shape: f32[2,1,8], index: 4, kind: output, shape index: {1}]  }
   0x1   :  { %12 = vsyncpa [#allocation3 + $0x1], 0 }
   0x2   :  { %13 = vsyncpa [#allocation6], 0 }
   0x3   :  { %14 = vsyncpa [#allocation4], 0 }
   0x4   :  { %16 = vsyncpa [#allocation4 + $0x1], 0 }
   0x5   :  { %17 = vsyncpa [#allocation9], 0 }
   0x6   :  { %19 = vsyncpa [#allocation9 + $0x1], 0  ;;  %s818_s15 = smov 0   ;;  %s820_s16 = smov 0  }
   0x7   :  { %s822_s17 = smov 0   ;;  %s824_s18 = smov 0  }
   0x8 LB: > { %s839_s19 = sadd.s32 4294967295, %s781_s18   ;;  %s511_s20 = sadd.s32 4294967294, %s781_s18   ;;  %s781_s18 = sphi %s824_s18, %s1076_s18   ;;  %s777_s17 = sphi %s822_s17, %s1075_s17   ;;  %s773_s16 = sphi %s820_s16, %s1074_s16   ;;  %s769_s15 = sphi %s818_s15, %s1073_s15  }
   0x9   : > { %p45_p0 = scmp.ne.s32.totalorder %s773_s16, %s769_s15  ;;  %p1057_p1 = scmp.eq.s32.totalorder %s839_s19, 0 }
   0xa   : > { %p117_p3 = scmp.eq.s32.totalorder %s511_s20, 1  ;;  %p512_p5 = scmp.ge.s32.totalorder %s781_s18, 1 }
   0xb   : > { %p848_p4 = por %p1057_p1, %p45_p0  ;;  %p150_p7 = scmp.lt.s32.totalorder %s781_s18, 3 }
   0xc   : > { %p853_p6 = por %p117_p3, %p45_p0  ;;  %s783_s24 = smov [#allocation5]  }
   0xd   : > { %s1060_s21 = scalar_select %p848_p4, 1, 0 }
   0xe   : > { %s1061_s22 = scalar_select %p853_p6, 1, 0 }
   0xf   : > { %p858_p8 = pnand %p512_p5, %p150_p7  ;;  %s162_s25 = sshll.u32 %s783_s24, 4  ;;  %s862_s25 = int_to_ptr.vmem [resolvable:$true] %s162_s25 }
  0x10   : > { %s874_s27 = sadd.s32 1, %s781_s18   ;;  %s32_s28 = sadd.s32 1, %s777_s17 }
  0x11   : > { %s1062_s23 = scalar_select %p858_p8, 1, 0 }
  0x12   : > { %p558_p9 = pneg %p858_p8  ;;  %s29_s29 = ssub.s32 %s781_s18, %s874_s27 }
  0x13   : > { %s621_s6 = scalar_lea.hbm %s1053_s1, 512 }
  0x14   : > { %p869_p11 = pnand %p558_p9, %p1057_p1  ;;  %p622_p12 = scmp.ne.s32.totalorder %s1053_s1, %s621_s6 }
  0x15   : > { %p628_p5 = scmp.lt.u32.totalorder %s621_s6, %s1053_s1 }
  0x16   : > { %p623_p13 = pneg %p869_p11 }
  0x18   : > { %p624_p0 = pnand %p623_p13, %p622_p12 }
  0x1a   : > { %p625_p3 = pneg %p624_p0 }
  0x1c   : > { %p630_p7 = pnand %p628_p5, %p625_p3 }
  0x1e   : > { %633 = shalt.err (!%p630_p7)
}
  0x1f   : > { %s634_s11 = scalar_lea.vmem %s862_s25, 512  ;;  %p642_p2 = scmp.lt.s32.totalorder %s862_s25, %s862_s25 }
  0x20   : > { %p635_p9 = scmp.ne.s32.totalorder %s862_s25, %s634_s11  ;;  %p643_p6 = scmp.lt.s32.totalorder %s634_s11, %s634_s11 }
  0x22   : > { %p637_p10 = pnand %p635_p9, %p623_p13  ;;  %p644_p4 = por %p643_p6, %p642_p2 }
  0x24   : > { %p638_p1 = pneg %p637_p10 }
  0x26   : > { %p645_p8 = pnand %p644_p4, %p638_p1 }
  0x28   : > { %648 = shalt.err (!%p645_p8)
}
  0x29   : > { %s784_s12 = smov 128   ;;  %s785_s13 = smov 8  }
  0x2a   : > { %561 = dma.hbm_to_vmem [thread:$0]  (!%p869_p11), %s1053_s1, 512, %s862_s25, [#allocation6], %s784_s12, %s784_s12, %s785_s13  }
  0x2b   : > { %p30_p2 = scmp.eq.s32.totalorder %s29_s29, 0  ;;  %p39_p1 = scmp.ne.s32.totalorder %s777_s17, %s773_s16 }
  0x2c   : > { %p40_p4 = scmp.eq.s32.totalorder %s781_s18, 0  ;;  %p574_p6 = scmp.lt.s32.totalorder %s781_s18, 2 }
  0x2d   : > { %s905_s24 = scalar_select %p30_p2, %s777_s17, %s32_s28  }
  0x2e   : > { %p41_p8 = por %p40_p4, %p39_p1  ;;  %p1064_p10 = scmp.eq.s32.totalorder %s839_s19, 1 }
  0x2f   : > { %s179_s5 = sand.u32 1, %s777_s17   ;;  %s516_s6 = sshll.u32 %s781_s18, 7 }
  0x30   : > { %p909_p12 = por %p1064_p10, %p39_p1  ;;  %s515_s7 = sshll.u32 %s179_s5, 3 }
  0x31   : > { %s918_s9 = scalar_lea.hbm %s1052_s0, %s516_s6  ;;  %s183_s25 = scalar_lea.vmem [#allocation2], %s515_s7 }
  0x32   : > { %s190_s28 = sshll.u32 %s183_s25, 4  ;;  %p920_p11 = pnand %p574_p6, %p41_p8  ;;  %s924_s28 = int_to_ptr.vmem [resolvable:$true] %s190_s28 }
  0x33   : > { %s180_s10 = scalar_lea.sflag [#allocation3], %s179_s5  ;;  %s649_s11 = scalar_lea.hbm %s918_s9, 128 }
  0x34   : > { %p650_p13 = scmp.ne.s32.totalorder %s918_s9, %s649_s11  ;;  %p651_p0 = pneg %p920_p11 }
  0x35   : > { %s654_s14 = scalar_lea.hbm %s1052_s0, 256  ;;  %p655_p7 = scmp.lt.u32.totalorder %s918_s9, %s1052_s0 }
  0x36   : > { %p652_p3 = pnand %p651_p0, %p650_p13  ;;  %p656_p9 = scmp.lt.u32.totalorder %s654_s14, %s649_s11 }
  0x37   : > { %p658_p1 = scmp.lt.u32.totalorder %s649_s11, %s918_s9 }
  0x38   : > { %p653_p5 = pneg %p652_p3  ;;  %p657_p2 = por %p656_p9, %p655_p7 }
  0x3a   : > { %p659_p4 = por %p658_p1, %p657_p2 }
  0x3c   : > { %p660_p6 = pnand %p659_p4, %p653_p5 }
  0x3e   : > { %663 = shalt.err (!%p660_p6)
}
  0x3f   : > { %s664_s5 = scalar_lea.vmem %s924_s28, 128  ;;  %s786_s7 = smov [#allocation2]  }
  0x40   : > { %p665_p8 = scmp.ne.s32.totalorder %s924_s28, %s664_s5  ;;  %s669_s26 = sshll.u32 %s786_s7, 4  ;;  %s670_s26 = int_to_ptr.vmem [resolvable:$false] %s669_s26 }
  0x41   : > { %s671_s8 = scalar_lea.vmem %s670_s26, 256  ;;  %p672_p3 = scmp.lt.s32.totalorder %s924_s28, %s670_s26 }
  0x42   : > { %p667_p10 = pnand %p665_p8, %p651_p0  ;;  %p673_p7 = scmp.lt.s32.totalorder %s671_s8, %s664_s5 }
  0x44   : > { %p668_p13 = pneg %p667_p10  ;;  %p674_p9 = por %p673_p7, %p672_p3 }
  0x46   : > { %p675_p2 = pnand %p674_p9, %p668_p13 }
  0x48   : > { %678 = shalt.err (!%p675_p2)
}
  0x49   : > { %565 = dma.hbm_to_vmem [thread:$0]  (!%p920_p11), %s918_s9, 128, %s924_s28, %s180_s10  }
  0x4a   : > { %p1067_p5 = scmp.ne.s32.totalorder %s1062_s23, 0 }
  0x4b   : > { %s954_s25 = sand.u32 (!%p1067_p5), 1, %s773_s16   ;;  %p1068_p0 = scmp.ne.s32.totalorder (!%p1067_p5), %s1060_s21, 0 }
  0x4c   : > { %199 = sbr.rel (%p1067_p5) target bundleno = 521 (0x209), region = 32  ;;  %s518_s11 = sshll.u32 (!%p1067_p5), %s954_s25, 3 }
  0x4d   : > { %s202_s12 = scalar_lea.sflag (!%p1067_p5), [#allocation3], %s954_s25  ;;  %s205_s13 = scalar_lea.vmem (!%p1067_p5), [#allocation2], %s518_s11 }
  0x53   : > { %752 = dma.done.wait (%p1068_p0), %s202_s12, 128  }
  0x54   : > { %754 = vsyncadd (%p1068_p0), %s202_s12, 4294967168  ;;  %p1069_p1 = scmp.eq.s32.totalorder %s839_s19, 0 }
  0x56   : > { %756 = dma.done.wait (%p1069_p1), [#allocation6], 512   ;;  %p1070_p11 = pmov %p1069_p1 }
  0x57   : > { %v787_v0 = vmov 0.0|0.0   ;;  %vm788_vm0 = vmmov 0   ;;  %v789_v1 = vmov 0.0   ;;  %v238_v2 = vld [vmem:[#allocation5] sm:$0xff]  ;;  %v239_v3 = vld [vmem:[#allocation5 + $0x8] sm:$0xff]  ;;  %v240_v4 = vld [vmem:[#allocation5 + $0x10] sm:$0xff] }
  0x58   : > { %758 = vsyncadd (%p1070_p11), [#allocation6], 4294966784  ;;  %542 = vmatprep.subr.bf16.mxu0 %v787_v0  ;;  %539 = vmatprep.mubr.msk.f32.mxu0 %vm788_vm0, %v789_v1  ;;  %v543_v5 = vpack.c.bf16 %v239_v3, %v238_v2  ;;  %v241_v6 = vld [vmem:[#allocation5 + $0x18] sm:$0xff]  ;;  %vm249_vm1 = vcmask 261120   ;;  %v790_v9 = vmov 0   ;;  %s522_s9 = sshll.u32 %s839_s19, 4 }
  0x59   : > { %v546_v7 = vpack.c.bf16 %v241_v6, %v240_v4  ;;  %v237_v8 = vld [vmem:[%s205_s13] sm:$0xff]  ;;  %616 = vset.pattern.permute.xlu0 %v790_v9  ;;  %s230_s28 = scalar_lea.vmem [#allocation7], %s954_s25  ;;  %s976_s20 = scalar_lea.hbm %s1055_s3, %s522_s9 }
  0x5a   : > { %544 = vmatpush3.bf16.msra.mxu0 %v543_v5  ;;  %v520_v10 = vld [vmem:[%s1054_s2] ss:$0 sm:$0xff]  ;;  %s394_s29 = sshll.u32 %s230_s28, 4  ;;  %s378_s6 = scalar_lea.sflag [#allocation4], %s954_s25  ;;  %s978_s29 = int_to_ptr.vmem [resolvable:$true] %s394_s29 }
  0x5b   : > { %545 = vmatprep.subr.bf16.mxu0 %v787_v0  ;;  %s679_s5 = scalar_lea.vmem %s978_s29, 16  ;;  %s791_s7 = smov [#allocation7]  }
  0x5c   : > { %p680_p4 = scmp.ne.s32.totalorder %s978_s29, %s679_s5  ;;  %s683_s26 = sshll.u32 %s791_s7, 4  ;;  %s684_s26 = int_to_ptr.vmem [resolvable:$false] %s683_s26 }
  0x5d   : > { %s685_s8 = scalar_lea.vmem %s684_s26, 32  ;;  %p686_p10 = scmp.lt.s32.totalorder %s978_s29, %s684_s26 }
  0x5e   : > { %547 = vmatpush3.bf16.msra.mxu0 %v546_v7  ;;  %p681_p6 = pnand %p680_p4, %p909_p12  ;;  %p687_p13 = scmp.lt.s32.totalorder %s685_s8, %s679_s5 }
  0x60   : > { %p682_p8 = pneg %p681_p6  ;;  %p688_p3 = por %p687_p13, %p686_p10 }
  0x61   : > { %540 = vmatmul.mubr.msk.f32.vlgmr.msra.gmra.mrb[0].mxu0 %vm249_vm1, %v237_v8 }
  0x62   : > { %p689_p7 = pnand %p688_p3, %p682_p8 }
 0x134   : > { %v319_v11 = vpop.f32.mrb[0].mxu0 }
 0x135   : > { %v320_v12 = vadd.f32 %v520_v10, %v319_v11  ;;  %v541_v13 = vpop.f32.mrb[1].mxu0 }
 0x137   : > { %v323_v14 = vsub.f32 0.0, %v320_v12 }
 0x139   : > { %v324_v15 = vmul.f32 1.442695, %v323_v14 }
 0x13b   : > { %617 = vpow2.f32 %v324_v15 }
 0x145   : > { %v618_v16 = vpop.eup %617 }
 0x146   : > { %v326_v17 = vmul.f32 20.0, %v618_v16 }
 0x148   : > { %v327_v18 = vadd.f32 1.0, %v326_v17 }
 0x14a   : > { %619 = vrcp.f32 %v327_v18 }
 0x154   : > { %v620_v19 = vpop.eup %619 }
 0x155   : > { %332 = vperm.xlu0 %616, %v620_v19  }
 0x173   : > { %343 = vxpose.xlu0.b32.start.end [1/1] (short) (narrow) %v620_v19, 8 }
 0x1d4   : > { %v333_v20 = vpop.permute.xlu0 %332 }
 0x1d5   : > { %v335_v21 = vmul.f32 %v333_v20, %v320_v12 }
 0x1d7   : > { %v336_v22 = vrot.slane %v335_v21, 4 }
 0x1d9   : > { %v337_v23 = vadd.f32 %v336_v22, %v335_v21 }
 0x1db   : > { %v338_v24 = vrot.slane %v337_v23, 2 }
 0x1dd   : > { %v339_v25 = vadd.f32 %v338_v24, %v337_v23 }
 0x1df   : > { %v340_v26 = vrot.slane %v339_v25, 1 }
 0x1e1   : > { %v341_v27 = vadd.f32 %v340_v26, %v339_v25 }
 0x1e3   : > { %342 = vst [vmem:[%s230_s28] sm:$0x1] %v341_v27 }
 0x1e4   : > { %692 = shalt.err (!%p689_p7)
}
 0x1e5   : > { %s693_s11 = scalar_lea.hbm %s976_s20, 16  ;;  %s697_s21 = scalar_lea.hbm %s1055_s3, 32 }
 0x1e6   : > { %p694_p9 = scmp.ne.s32.totalorder %s976_s20, %s693_s11  ;;  %p698_p0 = scmp.lt.u32.totalorder %s976_s20, %s1055_s3 }
 0x1e7   : > { %p699_p1 = scmp.lt.u32.totalorder %s697_s21, %s693_s11  ;;  %p701_p4 = scmp.lt.u32.totalorder %s693_s11, %s976_s20 }
 0x1e8   : > { %p695_p2 = pnand %p694_p9, %p909_p12 }
 0x1e9   : > { %p700_p11 = por %p699_p1, %p698_p0 }
 0x1ea   : > { %p696_p5 = pneg %p695_p2 }
 0x1eb   : > { %p702_p6 = por %p701_p4, %p700_p11 }
 0x1ed   : > { %p703_p8 = pnand %p702_p6, %p696_p5 }
 0x1ef   : > { %706 = shalt.err (!%p703_p8)
}
 0x1f0   : > { %554 = dma.vmem_to_hbm [thread:$0]  (%p909_p12), %s978_s29, 16, %s976_s20, %s378_s6   ;;  %vm375_vm2 = vcmask 57344  }
 0x1f1   : > { %s236_s10 = scalar_lea.vmem [#allocation8], %s954_s25  ;;  %s1008_s26 = scalar_lea.hbm %s1056_s4, %s522_s9 }
 0x1f2   : > { %s407_s14 = sshll.u32 %s236_s10, 4  ;;  %s382_s8 = scalar_lea.sflag [#allocation9], %s954_s25  ;;  %s1010_s14 = int_to_ptr.vmem [resolvable:$true] %s407_s14 }
 0x1f3   : > { %v359_v28 = vpop.trf.xlu0  ;;  %s707_s11 = scalar_lea.vmem %s1010_s14, 16  ;;  %s792_s29 = smov [#allocation8]  }
 0x1f4   : > { %376 = vst.msk [vmem:[%s236_s10] sm:$0x1] %vm375_vm2, %v359_v28  ;;  %p708_p10 = scmp.ne.s32.totalorder %s1010_s14, %s707_s11  ;;  %s711_s19 = sshll.u32 %s792_s29, 4  ;;  %s712_s19 = int_to_ptr.vmem [resolvable:$false] %s711_s19 }
 0x1f5   : > { %s713_s20 = scalar_lea.vmem %s712_s19, 32  ;;  %p714_p7 = scmp.lt.s32.totalorder %s1010_s14, %s712_s19 }
 0x1f6   : > { %p709_p13 = pnand %p708_p10, %p909_p12  ;;  %p715_p9 = scmp.lt.s32.totalorder %s713_s20, %s707_s11 }
 0x1f8   : > { %p710_p3 = pneg %p709_p13  ;;  %p716_p2 = por %p715_p9, %p714_p7 }
 0x1fa   : > { %p717_p5 = pnand %p716_p2, %p710_p3 }
 0x1fc   : > { %720 = shalt.err (!%p717_p5)
}
 0x1fd   : > { %s721_s25 = scalar_lea.hbm %s1008_s26, 16  ;;  %s725_s12 = scalar_lea.hbm %s1056_s4, 32 }
 0x1fe   : > { %p722_p0 = scmp.ne.s32.totalorder %s1008_s26, %s721_s25  ;;  %p726_p4 = scmp.lt.u32.totalorder %s1008_s26, %s1056_s4 }
 0x1ff   : > { %p727_p6 = scmp.lt.u32.totalorder %s725_s12, %s721_s25  ;;  %p729_p10 = scmp.lt.u32.totalorder %s721_s25, %s1008_s26 }
 0x200   : > { %p723_p1 = pnand %p722_p0, %p909_p12 }
 0x201   : > { %p728_p8 = por %p727_p6, %p726_p4 }
 0x202   : > { %p724_p11 = pneg %p723_p1 }
 0x203   : > { %p730_p13 = por %p729_p10, %p728_p8 }
 0x205   : > { %p731_p3 = pnand %p730_p13, %p724_p11 }
 0x207   : > { %734 = shalt.err (!%p731_p3)
}
 0x208   : > { %555 = dma.vmem_to_hbm [thread:$0]  (%p909_p12), %s1010_s14, 16, %s1008_s26, %s382_s8  }
 0x209 PF: > { %s419_s23 = sand.u32 1, %s769_s15   ;;  %p1071_p7 = scmp.ne.s32.totalorder %s1061_s22, 0 }
 0x20a   : > { %p1072_p9 = scmp.ge.s32.totalorder %s781_s18, 2  ;;  %s420_s28 = scalar_lea.sflag [#allocation4], %s419_s23 }
 0x20c   : > { %p567_p2 = pnand %p1072_p9, %p1071_p7 }
 0x20e   : > { %760 = dma.done.wait (!%p567_p2), %s420_s28, 16  }
 0x20f   : > { %762 = vsyncadd (!%p567_p2), %s420_s28, 4294967280  ;;  %s428_s10 = scalar_lea.sflag [#allocation9], %s419_s23 }
 0x210   : > { %764 = dma.done.wait (!%p567_p2), %s428_s10, 16  }
 0x211   : > { %766 = vsyncadd (!%p567_p2), %s428_s10, 4294967280  ;;  %p22_p12 = scmp.ge.s32.totalorder %s874_s27, 4   ;;  %s1073_s15 = smov %s773_s16 }
 0x212   : > { %s1074_s16 = smov %s777_s17  ;;  %s1075_s17 = smov %s905_s24 }
 0x213   : > { %s1076_s18 = smov %s874_s27  ;;  %24 = sbr.rel (!%p22_p12) target bundleno = 8 (0x8), region = 98 }
 0x21a   :  { %432 = vsyncpa [#allocation3], 1 }
 0x21b   :  { %434 = vsyncpa [#allocation3 + $0x1], 1 }
 0x21c   :  { %435 = vsyncpa [#allocation6], 1 }
 0x21d   :  { %436 = vsyncpa [#allocation4], 1 }
 0x21e   :  { %438 = vsyncpa [#allocation4 + $0x1], 1 }
 0x21f   :  { %439 = vsyncpa [#allocation9], 1 }
 0x220   :  { %441 = vsyncpa [#allocation9 + $0x1], 1 }

</bundles_post_ra>
